<compile_context>
chip_gen: v7x
topology: tpu7x:2x2x1
jax: 0.10.0
libtpu: 0.0.40
codegen_flags: <defaults>
</compile_context>

<pallas_src>
import functools
from math import gcd

import jax
import jax.numpy as jnp
from jax.experimental import pallas as pl
from jax.experimental.pallas import tpu as pltpu

_MIB = 1024 * 1024
_TARGET_TILE_BYTES = 4 * _MIB  # per x / out buffer


def _locked_dropout_kernel(x_ref, m_ref, o_ref):
    # Pure VPU broadcast-multiply. The mask block either matches the x block
    # exactly (flattened lane-dense path) or broadcasts over the sequence
    # (dense 3-D path).
    o_ref[...] = x_ref[...] * m_ref[...]


def _plan_dense(B, S, H, itemsize):
    """Tile plan for H % 128 == 0: blocks (bt, ts, H)."""
    pack = max(1, 4 // itemsize)
    sub = 8 * pack  # dtype-aware sublane granularity for the seq axis
    row_bytes = H * itemsize
    rows = max(1, _TARGET_TILE_BYTES // row_bytes)
    if S <= rows:
        ts = S
        bt = max(1, min(B, rows // max(S, 1)))
    else:
        ts = min(S, max(sub, (rows // sub) * sub))
        bt = 1
    return bt, ts


def _plan_flat(B, S, H, itemsize):
    """Tile plan for the flattened (B, S*H) path: blocks (bt, ts*H)."""
    pack = max(1, 4 // itemsize)
    sub = 8 * pack                 # sublane granularity for the batch axis
    unit = 128 // gcd(H, 128)      # smallest ts with ts*H % 128 == 0
    bt = B if B <= sub else sub    # full (small) batch, or dense sublanes
    per_unit = bt * unit * H * itemsize
    n_units = max(1, _TARGET_TILE_BYTES // per_unit)
    ts = min(S, n_units * unit)
    if ts == S:  # lanes maxed out; spend remaining budget on the batch axis
        rows = max(1, _TARGET_TILE_BYTES // (S * H * itemsize))
        if rows >= B:
            bt = B
        elif rows > bt:
            bt = max(bt, (rows // sub) * sub)
    return bt, ts


def _compiler_params(tile_bytes):
    # Double-buffered footprint of all pipelined buffers + slack, floored
    # above v5e's 16 MiB scoped default and capped below v7x's 32 MiB
    # scoped default (64 MiB physical).
    needed = 2 * sum(tile_bytes) + 4 * _MIB
    limit = int(min(max(needed, 16 * _MIB), 32 * _MIB))
    return pltpu.CompilerParams(
        dimension_semantics=("parallel", "parallel"),
        vmem_limit_bytes=limit,
    )


@functools.partial(jax.jit, static_argnames=("dropout_rate",))
def _locked_dropout_impl(x, key, dropout_rate):
    B, S, H = x.shape
    keep_prob = 1.0 - dropout_rate
    itemsize = jnp.dtype(x.dtype).itemsize

    # One bernoulli draw per (batch, hidden) unit, locked across the sequence.
    # NOTE: the 1/keep_prob scale is materialized directly in x.dtype; for
    # bf16 and p values like 0.1 this rounds slightly (matches PyTorch
    # half-precision behavior). Values for p=0.5 (0 or 2) are exact.
    keep = jax.random.bernoulli(key, p=keep_prob, shape=(B, H))
    mask_bh = keep.astype(x.dtype) * jnp.asarray(1.0 / keep_prob, dtype=x.dtype)

    if H % 128 == 0:
        # Lane axis already dense: 3-D blocks, tiny broadcast mask.
        bt, ts = _plan_dense(B, S, H, itemsize)
        mask = mask_bh[:, None, :]  # (B, 1, H)
        x_tile = bt * ts * H * itemsize
        m_tile = bt * H * itemsize
        grid = (pl.cdiv(B, bt), pl.cdiv(S, ts))  # seq innermost: mask DMA'd once/batch tile
        return pl.pallas_call(
            _locked_dropout_kernel,
            out_shape=jax.ShapeDtypeStruct((B, S, H), x.dtype),
            grid=grid,
            in_specs=[
                pl.BlockSpec((bt, ts, H), lambda bi, si: (bi, si, 0)),
                pl.BlockSpec((bt, 1, H), lambda bi, si: (bi, 0, 0)),
            ],
            out_specs=pl.BlockSpec((bt, ts, H), lambda bi, si: (bi, si, 0)),
            compiler_params=_compiler_params([x_tile, x_tile, m_tile]),
        )(x, mask)

    # H not a multiple of 128: collapse (seq, hidden) into a lane-dense last
    # dim so stores are full-width instead of masked partial stores.
    bt, ts = _plan_flat(B, S, H, itemsize)
    x2 = x.reshape(B, S * H)
    # Pre-tile the per-(batch, hidden) mask along the seq tile so it lines up
    # with the flattened lanes; constant block index over the (innermost) seq
    # grid axis, so it is DMA'd only once per batch tile.
    mask2 = jnp.broadcast_to(mask_bh[:, None, :], (B, ts, H)).reshape(B, ts * H)
    x_tile = bt * ts * H * itemsize
    grid = (pl.cdiv(B, bt), pl.cdiv(S, ts))
    out2 = pl.pallas_call(
        _locked_dropout_kernel,
        out_shape=jax.ShapeDtypeStruct((B, S * H), x.dtype),
        grid=grid,
        in_specs=[
            pl.BlockSpec((bt, ts * H), lambda bi, si: (bi, si)),
            pl.BlockSpec((bt, ts * H), lambda bi, si: (bi, 0)),
        ],
        out_specs=pl.BlockSpec((bt, ts * H), lambda bi, si: (bi, si)),
        compiler_params=_compiler_params([x_tile, x_tile, x_tile]),
    )(x2, mask2)
    return out2.reshape(B, S, H)


def locked_dropout(x, key, dropout_rate=0.5, training=True, batch_first=True):
    """Locked / variational dropout.

    batch_first=True:  x is (B, S, H), mask shape (B, 1, H).
    batch_first=False: x is (S, B, H), mask shape (1, B, H).
    """
    if not training or not dropout_rate:
        return x
    if not batch_first:
        # Same semantics after swapping the first two axes.
        # TODO(synk): direct (S, B, H)-layout kernel to avoid the two XLA transposes.
        y = _locked_dropout_impl(jnp.swapaxes(x, 0, 1), key, float(dropout_rate))
        return jnp.swapaxes(y, 0, 1)
    return _locked_dropout_impl(x, key, float(dropout_rate))


if __name__ == "__main__":
    root = jax.random.PRNGKey(0)
    xkey, mkey, xkey2, mkey2 = jax.random.split(root, 4)

    # Case 1: H = 32 (not a multiple of 128) -> flattened lane-dense path.
    B, S, H = 2, 8, 32
    x = jax.random.normal(xkey, (B, S, H), dtype=jnp.float32)
    out = jax.block_until_ready(locked_dropout(x, mkey, dropout_rate=0.5, training=True))
    assert out.shape == (B, S, H) and out.dtype == x.dtype

    # Mask locked across the sequence axis (same hidden units dropped at
    # every seq position of a given batch element).
    ratio = out / jnp.where(x == 0, 1.0, x)
    assert bool(jnp.all(jnp.abs(ratio - ratio[:, :1, :]) < 1e-5)), "mask not locked"
    # Every element is either 0 or x / keep_prob = 2x.
    assert bool(jnp.all((jnp.abs(out) < 1e-6) | (jnp.abs(out - 2.0 * x) < 1e-5)))

    # Case 2: H = 128 -> dense 3-D path.
    B2, S2, H2 = 2, 16, 128
    x2 = jax.random.normal(xkey2, (B2, S2, H2), dtype=jnp.float32)
    out2 = jax.block_until_ready(locked_dropout(x2, mkey2, dropout_rate=0.5, training=True))
    ratio2 = out2 / jnp.where(x2 == 0, 1.0, x2)
    assert bool(jnp.all(jnp.abs(ratio2 - ratio2[:, :1, :]) < 1e-5)), "mask not locked"
    assert bool(jnp.all((jnp.abs(out2) < 1e-6) | (jnp.abs(out2 - 2.0 * x2) < 1e-5)))

    # Eval mode / p = 0 passthrough.
    assert jnp.array_equal(locked_dropout(x, mkey, 0.5, training=False), x)
    assert jnp.array_equal(locked_dropout(x, mkey, 0.0, training=True), x)

    print("KERNEL_OK")
</pallas_src>

<mosaic_0001>
module attributes {stable_mosaic.version = 11 : i64} {
  func.func @_locked_dropout_kernel(%arg0: i32, %arg1: i32, %arg2: memref<2x256xf32, #tpu.memory_space<vmem>>, %arg3: memref<2x256xf32, #tpu.memory_space<vmem>>, %arg4: memref<2x256xf32, #tpu.memory_space<vmem>>) attributes {dimension_semantics = [#tpu.dimension_semantics<parallel>, #tpu.dimension_semantics<parallel>], iteration_bounds = array<i64: 1, 1>, scalar_prefetch = 0 : i64, scratch_operands = 0 : i64, tpu.core_type = #tpu.core_type<tc>, window_params = [{transform_indices = @transform_0, window_bounds = array<i64: 2, 256>}, {transform_indices = @transform_1, window_bounds = array<i64: 2, 256>}, {transform_indices = @transform_2, window_bounds = array<i64: 2, 256>}]} {
    %c0 = arith.constant 0 : index
    %c0_0 = arith.constant 0 : index
    %0 = vector.load %arg2[%c0, %c0_0] : memref<2x256xf32, #tpu.memory_space<vmem>>, vector<2x256xf32>
    %c0_1 = arith.constant 0 : index
    %c0_2 = arith.constant 0 : index
    %1 = vector.load %arg3[%c0_1, %c0_2] : memref<2x256xf32, #tpu.memory_space<vmem>>, vector<2x256xf32>
    %2 = arith.mulf %0, %1 : vector<2x256xf32>
    %c0_3 = arith.constant 0 : index
    %c0_4 = arith.constant 0 : index
    %3 = vector.load %arg4[%c0_3, %c0_4] : memref<2x256xf32, #tpu.memory_space<vmem>>, vector<2x256xf32>
    tpu.vector_store %arg4[%c0_3, %c0_4], %2 {strides = array<i32>} : memref<2x256xf32, #tpu.memory_space<vmem>>, vector<2x256xf32>,
    return
  }
  func.func @transform_0(%arg0: i32, %arg1: i32) -> (i32, i32) {
    %c0_i32 = arith.constant 0 : i32
    return %arg0, %arg1 : i32, i32
  }
  func.func @transform_1(%arg0: i32, %arg1: i32) -> (i32, i32) {
    %c0_i32 = arith.constant 0 : i32
    %c0_i32_0 = arith.constant 0 : i32
    return %arg0, %c0_i32 : i32, i32
  }
  func.func @transform_2(%arg0: i32, %arg1: i32) -> (i32, i32) {
    %c0_i32 = arith.constant 0 : i32
    return %arg0, %arg1 : i32, i32
  }
}

</mosaic_0001>

<bundles_post_ra>
// kernel: _locked_dropout_impl.1
= control target key start
LH: loop header
LB: loop body
LE: loop exit
PB: predicated region body
PF: predicated region fallthrough
CT: control target
= control target key end

     0   :  { %s43_s0 = inlined_call_operand.vmem [shape: f32[2,256], index: 0, kind: input, shape index: {}]   ;;  %s44_s1 = inlined_call_operand.vmem [shape: f32[2,256], index: 1, kind: input, shape index: {}]   ;;  %s45_s2 = inlined_call_operand.vmem [shape: f32[2,256], index: 2, kind: output, shape index: {}]  }
   0x1   :  { %v11_v0 = vld [vmem:[%s43_s0] sm:$0xf] }
   0x2   :  { %v12_v1 = vld [vmem:[%s44_s1] sm:$0xf] }
   0x3   :  { %v13_v2 = vmul.f32 %v12_v1, %v11_v0 }
   0x5   :  { %14 = vst [vmem:[%s45_s2] sm:$0xf] %v13_v2 }

</bundles_post_ra>
